<compile_context>
chip_gen: v5e
topology: v5e:2x2
jax: 0.10.0
libtpu: 0.0.40
codegen_flags: <defaults>
</compile_context>

<pallas_src>
import functools

import jax
import jax.numpy as jnp
from jax import lax
from jax.experimental import pallas as pl
from jax.experimental.pallas import tpu as pltpu


# --------------------------------------------------------------------------- #
# Kernel
# --------------------------------------------------------------------------- #
def _make_kernel(Hp, Mp, WCo):
    """Hp = H + 2 rows per padded image, Mp = N*Hp stacked rows, WCo = W*Cout."""

    def kernel(xcat_ref, w1_ref, w2_ref, sb_ref, out_ref):
        # ---- conv1 + fused shortcut: a single MXU matmul --------------------
        #   xcat : (Mp, 3*W*Cin)        = [x[r-1] | x[r] | x[r+1]]   (bf16)
        #   w1cat: (3*W*Cin, 2*W*Cout)  = [conv1 band | shortcut band]
        acc = jnp.dot(xcat_ref[...], w1_ref[...],
                      preferred_element_type=jnp.float32)        # (Mp, 2*WCo) f32

        # bn1 + relu on the conv1 half; bn_sc (or identity) on the shortcut half
        out1 = jnp.maximum(acc[:, :WCo] * sb_ref[0:1, :] + sb_ref[1:2, :], 0.0)
        sc = acc[:, WCo:] * sb_ref[4:5, :] + sb_ref[5:6, :]

        # ---- re-zero per-image halo rows so conv2 sees proper zero padding --
        # (float arithmetic instead of integer rem for lowering robustness)
        row = lax.broadcasted_iota(jnp.int32, (Mp, WCo), 0).astype(jnp.float32)
        local = row - Hp * jnp.floor(row * (1.0 / Hp))   # row index inside image
        interior = (local > 0.5) & (local < Hp - 1.5)
        out1 = jnp.where(interior, out1, 0.0)

        # ---- conv2: kh taps concatenated along K, single MXU matmul ---------
        zrow = jnp.zeros((1, WCo), out1.dtype)
        a2 = jnp.concatenate(
            [jnp.concatenate([zrow, out1[:-1, :]], axis=0),   # tap kh=0: row r-1
             out1,                                            # tap kh=1: row r
             jnp.concatenate([out1[1:, :], zrow], axis=0)],   # tap kh=2: row r+1
            axis=1)                                           # (Mp, 3*WCo)
        acc2 = jnp.dot(a2.astype(jnp.bfloat16), w2_ref[...],
                       preferred_element_type=jnp.float32)    # (Mp, WCo) f32

        # ---- bn2 + residual add + relu (f32 epilogue, lane-dense store) -----
        out_ref[...] = jnp.maximum(
            acc2 * sb_ref[2:3, :] + sb_ref[3:4, :] + sc, 0.0)

    return kernel


# --------------------------------------------------------------------------- #
# Weight preparation (plain JAX, one-time)
# --------------------------------------------------------------------------- #
def _band_conv_weight(w_hwio, Wdim):
    """(3,3,Ci,Co) conv weights -> (3, Wdim*Ci, Wdim*Co) block-banded matrices.

    Band[kh][wi*Ci+ci, wo*Co+co] = w[kh, kw, ci, co] with wi = wo + kw - 1
    (missing taps at the width boundary are simply absent == zero padding).
    """
    _, _, Ci, Co = w_hwio.shape
    band = jnp.stack([jnp.eye(Wdim, k=1 - kw, dtype=jnp.float32)
                      for kw in range(3)])                       # (3, W, W)
    wb = jnp.einsum('kio,hkcd->hicod', band, w_hwio.astype(jnp.float32))
    return wb.reshape(3, Wdim * Ci, Wdim * Co)


def _block_diag_weight(w_io, Wdim):
    """1x1 conv (Ci,Co) -> block-diagonal (Wdim*Ci, Wdim*Co) matrix."""
    Ci, Co = w_io.shape
    wb = jnp.einsum('io,cd->icod', jnp.eye(Wdim, dtype=jnp.float32),
                    w_io.astype(jnp.float32))
    return wb.reshape(Wdim * Ci, Wdim * Co)


# --------------------------------------------------------------------------- #
# Wrapper
# --------------------------------------------------------------------------- #
def residual_block_pallas(x_nchw, p, stride=1):
    assert stride == 1, "only stride=1 supported"
    N, Cin, H, W = x_nchw.shape
    Cout = p['w1_hwio'].shape[-1]
    Hp = H + 2
    Mp = N * Hp
    WCi, WCo = W * Cin, W * Cout
    has_proj = (Cin != Cout) or (stride != 1)
    cdt = jnp.bfloat16                           # MXU operand dtype

    # ---- activation layout: NCHW -> (N*(H+2), W*Cin) with zero halo rows,
    #      then im2col over kh along lanes -> (Mp, 3*W*Cin) bf16 -------------
    x = jnp.transpose(x_nchw, (0, 2, 3, 1)).astype(jnp.float32)
    xr = x.reshape(N, H, WCi)
    xp = jnp.pad(xr, ((0, 0), (1, 1), (0, 0))).reshape(Mp, WCi)
    zrow = jnp.zeros((1, WCi), jnp.float32)
    xcat = jnp.concatenate(
        [jnp.concatenate([zrow, xp[:-1]], axis=0),      # x[r-1]  (kh=0 tap)
         xp,                                            # x[r]    (kh=1 tap)
         jnp.concatenate([xp[1:], zrow], axis=0)],      # x[r+1]  (kh=2 tap)
        axis=1).astype(cdt)                             # (Mp, 3*W*Cin)

    # ---- conv weights -> kh-stacked banded matrices; shortcut fused into
    #      extra output columns of conv1's weight -----------------------------
    w1b = _band_conv_weight(p['w1_hwio'], W).reshape(3 * WCi, WCo)
    if has_proj:
        wsc = _block_diag_weight(p['wsc_hwio'].reshape(Cin, Cout), W)
        ssc, bsc = p['ssc'], p['bsc']
    else:
        wsc = jnp.eye(WCi, dtype=jnp.float32)           # identity shortcut
        ssc = jnp.ones((1, Cout), jnp.float32)
        bsc = jnp.zeros((1, Cout), jnp.float32)
    wsc_rows = jnp.zeros((3 * WCi, WCo), jnp.float32).at[WCi:2 * WCi, :].set(wsc)
    w1cat = jnp.concatenate([w1b, wsc_rows], axis=1).astype(cdt)  # (3*WCi, 2*WCo)
    w2cat = _band_conv_weight(p['w2_hwio'], W).reshape(3 * WCo, WCo).astype(cdt)

    # ---- all BN scale/shift rows merged into one (8, W*Cout) f32 input ------
    def lane_tile(v):
        return jnp.tile(jnp.asarray(v, jnp.float32).reshape(1, Cout), (1, W))
    sb = jnp.concatenate(
        [lane_tile(p['s1']), lane_tile(p['b1']),
         lane_tile(p['s2']), lane_tile(p['b2']),
         lane_tile(ssc), lane_tile(bsc),
         jnp.zeros((2, WCo), jnp.float32)], axis=0)               # (8, W*Cout)

    kernel = _make_kernel(Hp, Mp, WCo)
    y = pl.pallas_call(
        kernel,
        out_shape=jax.ShapeDtypeStruct((Mp, WCo), jnp.float32),
        grid=(1,),                                   # whole batch in one step
        in_specs=[
            pl.BlockSpec((Mp, 3 * WCi), lambda i: (0, 0)),
            pl.BlockSpec((3 * WCi, 2 * WCo), lambda i: (0, 0)),
            pl.BlockSpec((3 * WCo, WCo), lambda i: (0, 0)),
            pl.BlockSpec((8, WCo), lambda i: (0, 0)),
        ],
        out_specs=pl.BlockSpec((Mp, WCo), lambda i: (0, 0)),
        compiler_params=pltpu.CompilerParams(
            dimension_semantics=("arbitrary",)),
    )(xcat, w1cat, w2cat, sb)

    # drop halo rows, (N, H, W*Cout) -> NCHW
    y = y.reshape(N, Hp, W, Cout)[:, 1:H + 1]
    return jnp.transpose(y, (0, 3, 1, 2))


# --------------------------------------------------------------------------- #
# Parameter init (deterministic, inference-mode BN folded to scale/shift)
# --------------------------------------------------------------------------- #
def init_params(key, cin, cout):
    ks = jax.random.split(key, 6)

    def bn(k):
        k1, k2, k3, k4 = jax.random.split(k, 4)
        gamma = 1.0 + 0.1 * jax.random.normal(k1, (cout,), jnp.float32)
        beta = 0.1 * jax.random.normal(k2, (cout,), jnp.float32)
        mean = 0.1 * jax.random.normal(k3, (cout,), jnp.float32)
        var = 0.5 + 0.5 * jnp.abs(jax.random.normal(k4, (cout,), jnp.float32))
        scale = gamma / jnp.sqrt(var + 1e-5)
        shift = beta - mean * scale
        return scale.reshape(1, cout), shift.reshape(1, cout)

    w1 = jax.random.normal(ks[0], (3, 3, cin, cout), jnp.float32) / (3.0 * cin ** 0.5)
    w2 = jax.random.normal(ks[1], (3, 3, cout, cout), jnp.float32) / (3.0 * cout ** 0.5)
    s1, b1 = bn(ks[2])
    s2, b2 = bn(ks[3])
    if cin != cout:
        wsc = jax.random.normal(ks[4], (1, 1, cin, cout), jnp.float32) / (cin ** 0.5)
        ssc, bsc = bn(ks[5])
    else:
        wsc, ssc, bsc = None, None, None
    return dict(w1_hwio=w1, w2_hwio=w2, s1=s1, b1=b1, s2=s2, b2=b2,
                wsc_hwio=wsc, ssc=ssc, bsc=bsc)


def ref_forward(x_nchw, p):
    """Pure-JAX f32 reference (NHWC convs, inference-mode BN)."""
    hp = lax.Precision.HIGHEST
    dn = ('NHWC', 'HWIO', 'NHWC')
    x = jnp.transpose(x_nchw, (0, 2, 3, 1)).astype(jnp.float32)
    y = lax.conv_general_dilated(x, p['w1_hwio'], (1, 1), 'SAME',
                                 dimension_numbers=dn, precision=hp)
    y = jnp.maximum(y * p['s1'] + p['b1'], 0.0)
    y = lax.conv_general_dilated(y, p['w2_hwio'], (1, 1), 'SAME',
                                 dimension_numbers=dn, precision=hp)
    y = y * p['s2'] + p['b2']
    if p['wsc_hwio'] is not None:
        sc = lax.conv_general_dilated(x, p['wsc_hwio'], (1, 1), 'SAME',
                                      dimension_numbers=dn, precision=hp)
        sc = sc * p['ssc'] + p['bsc']
    else:
        sc = x
    out = jnp.maximum(y + sc, 0.0)
    return jnp.transpose(out, (0, 3, 1, 2))


if __name__ == "__main__":
    key = jax.random.PRNGKey(0)
    kx, kp = jax.random.split(key)

    N, Cin, Cout, H, W = 2, 4, 8, 16, 16   # Cin != Cout -> projection shortcut
    x = jax.random.normal(kx, (N, Cin, H, W), jnp.float32)
    params = init_params(kp, Cin, Cout)

    fwd = jax.jit(functools.partial(residual_block_pallas, stride=1))
    out = jax.block_until_ready(fwd(x, params))

    ref = ref_forward(x, params)
    assert out.shape == (N, Cout, H, W), out.shape
    # Tolerance accounts for bf16 MXU operands (f32 accumulation) vs f32 reference.
    if not jnp.allclose(out, ref, rtol=2e-2, atol=5e-2):
        err = float(jnp.max(jnp.abs(out - ref)))
        raise AssertionError(f"Pallas output mismatch vs reference, max abs err {err}")

    print("KERNEL_OK")
</pallas_src>

<mosaic_0001>
module attributes {stable_mosaic.version = 11 : i64} {
  func.func @kernel(%arg0: i32, %arg1: memref<36x192xbf16, #tpu.memory_space<vmem>>, %arg2: memref<192x256xbf16, #tpu.memory_space<vmem>>, %arg3: memref<384x128xbf16, #tpu.memory_space<vmem>>, %arg4: memref<8x128xf32, #tpu.memory_space<vmem>>, %arg5: memref<36x128xf32, #tpu.memory_space<vmem>>) attributes {dimension_semantics = [#tpu.dimension_semantics<arbitrary>], iteration_bounds = array<i64: 1>, scalar_prefetch = 0 : i64, scratch_operands = 0 : i64, tpu.core_type = #tpu.core_type<tc>, window_params = [{pipeline_mode = #tpu.pipeline_mode<synchronous>, transform_indices = @transform_0, window_bounds = array<i64: 36, 192>}, {pipeline_mode = #tpu.pipeline_mode<synchronous>, transform_indices = @transform_1, window_bounds = array<i64: 192, 256>}, {pipeline_mode = #tpu.pipeline_mode<synchronous>, transform_indices = @transform_2, window_bounds = array<i64: 384, 128>}, {pipeline_mode = #tpu.pipeline_mode<synchronous>, transform_indices = @transform_3, window_bounds = array<i64: 8, 128>}, {pipeline_mode = #tpu.pipeline_mode<synchronous>, transform_indices = @transform_4, window_bounds = array<i64: 36, 128>}]} {
    %c0 = arith.constant 0 : index
    %c0_0 = arith.constant 0 : index
    %0 = vector.load %arg1[%c0, %c0_0] : memref<36x192xbf16, #tpu.memory_space<vmem>>, vector<36x192xbf16>
    %c0_1 = arith.constant 0 : index
    %c0_2 = arith.constant 0 : index
    %1 = vector.load %arg2[%c0_1, %c0_2] : memref<192x256xbf16, #tpu.memory_space<vmem>>, vector<192x256xbf16>
    %cst = arith.constant dense<0.000000e+00> : vector<36x256xf32>
    %2 = tpu.matmul %0, %1, %cst {dimension_numbers = #tpu.dot_dimension_numbers<[1], [0], [0], [1], [0, 0, 1, 1], [], []>} : vector<36x192xbf16>, vector<192x256xbf16>, vector<36x256xf32> -> vector<36x256xf32>
    %3 = vector.extract_strided_slice %2 {offsets = [0, 0], sizes = [36, 128], strides = [1, 1]} : vector<36x256xf32> to vector<36x128xf32>
    %c0_3 = arith.constant 0 : index
    %c0_4 = arith.constant 0 : index
    %4 = vector.load %arg4[%c0_3, %c0_4] : memref<8x128xf32, #tpu.memory_space<vmem>>, vector<1x128xf32>
    %5 = vector.broadcast %4 : vector<1x128xf32> to vector<36x128xf32>
    %6 = arith.mulf %3, %5 : vector<36x128xf32>
    %c1 = arith.constant 1 : index
    %c0_5 = arith.constant 0 : index
    %7 = vector.load %arg4[%c1, %c0_5] : memref<8x128xf32, #tpu.memory_space<vmem>>, vector<1x128xf32>
    %8 = vector.broadcast %7 : vector<1x128xf32> to vector<36x128xf32>
    %9 = arith.addf %6, %8 : vector<36x128xf32>
    %cst_6 = arith.constant 0.000000e+00 : f32
    %10 = vector.broadcast %cst_6 : f32 to vector<36x128xf32>
    %11 = arith.maximumf %9, %10 : vector<36x128xf32>
    %12 = vector.extract_strided_slice %2 {offsets = [0, 128], sizes = [36, 128], strides = [1, 1]} : vector<36x256xf32> to vector<36x128xf32>
    %c4 = arith.constant 4 : index
    %c0_7 = arith.constant 0 : index
    %13 = vector.load %arg4[%c4, %c0_7] : memref<8x128xf32, #tpu.memory_space<vmem>>, vector<1x128xf32>
    %14 = vector.broadcast %13 : vector<1x128xf32> to vector<36x128xf32>
    %15 = arith.mulf %12, %14 : vector<36x128xf32>
    %c5 = arith.constant 5 : index
    %c0_8 = arith.constant 0 : index
    %16 = vector.load %arg4[%c5, %c0_8] : memref<8x128xf32, #tpu.memory_space<vmem>>, vector<1x128xf32>
    %17 = vector.broadcast %16 : vector<1x128xf32> to vector<36x128xf32>
    %18 = arith.addf %15, %17 : vector<36x128xf32>
    %19 = tpu.iota {dimensions = array<i32: 0>} : vector<36x128xi32>
    %20 = arith.sitofp %19 : vector<36x128xi32> to vector<36x128xf32>
    %cst_9 = arith.constant 0.055555556 : f32
    %21 = vector.broadcast %cst_9 : f32 to vector<36x128xf32>
    %22 = arith.mulf %20, %21 : vector<36x128xf32>
    %23 = math.floor %22 : vector<36x128xf32>
    %cst_10 = arith.constant 1.800000e+01 : f32
    %24 = vector.broadcast %cst_10 : f32 to vector<36x128xf32>
    %25 = arith.mulf %24, %23 : vector<36x128xf32>
    %26 = arith.subf %20, %25 : vector<36x128xf32>
    %cst_11 = arith.constant 5.000000e-01 : f32
    %27 = vector.broadcast %cst_11 : f32 to vector<36x128xf32>
    %28 = arith.cmpf ogt, %26, %27 : vector<36x128xf32>
    %cst_12 = arith.constant 1.650000e+01 : f32
    %29 = vector.broadcast %cst_12 : f32 to vector<36x128xf32>
    %30 = arith.cmpf olt, %26, %29 : vector<36x128xf32>
    %31 = arith.andi %28, %30 : vector<36x128xi1>
    %cst_13 = arith.constant 0.000000e+00 : f32
    %32 = vector.broadcast %cst_13 : f32 to vector<36x128xf32>
    %33 = arith.select %31, %11, %32 : vector<36x128xi1>, vector<36x128xf32>
    %cst_14 = arith.constant 0.000000e+00 : f32
    %34 = vector.broadcast %cst_14 : f32 to vector<1x128xf32>
    %35 = vector.extract_strided_slice %33 {offsets = [0, 0], sizes = [35, 128], strides = [1, 1]} : vector<36x128xf32> to vector<35x128xf32>
    %36 = tpu.concatenate %34, %35 in 0 : vector<1x128xf32>, vector<35x128xf32> -> vector<36x128xf32>
    %37 = vector.extract_strided_slice %33 {offsets = [1, 0], sizes = [35, 128], strides = [1, 1]} : vector<36x128xf32> to vector<35x128xf32>
    %38 = tpu.concatenate %37, %34 in 0 : vector<35x128xf32>, vector<1x128xf32> -> vector<36x128xf32>
    %39 = tpu.concatenate %36, %33, %38 in 1 : vector<36x128xf32>, vector<36x128xf32>, vector<36x128xf32> -> vector<36x384xf32>
    %40 = arith.truncf %39 : vector<36x384xf32> to vector<36x384xbf16>
    %c0_15 = arith.constant 0 : index
    %c0_16 = arith.constant 0 : index
    %41 = vector.load %arg3[%c0_15, %c0_16] : memref<384x128xbf16, #tpu.memory_space<vmem>>, vector<384x128xbf16>
    %cst_17 = arith.constant dense<0.000000e+00> : vector<36x128xf32>
    %42 = tpu.matmul %40, %41, %cst_17 {dimension_numbers = #tpu.dot_dimension_numbers<[1], [0], [0], [1], [0, 0, 1, 1], [], []>} : vector<36x384xbf16>, vector<384x128xbf16>, vector<36x128xf32> -> vector<36x128xf32>
    %c2 = arith.constant 2 : index
    %c0_18 = arith.constant 0 : index
    %43 = vector.load %arg4[%c2, %c0_18] : memref<8x128xf32, #tpu.memory_space<vmem>>, vector<1x128xf32>
    %44 = vector.broadcast %43 : vector<1x128xf32> to vector<36x128xf32>
    %45 = arith.mulf %42, %44 : vector<36x128xf32>
    %c3 = arith.constant 3 : index
    %c0_19 = arith.constant 0 : index
    %46 = vector.load %arg4[%c3, %c0_19] : memref<8x128xf32, #tpu.memory_space<vmem>>, vector<1x128xf32>
    %47 = vector.broadcast %46 : vector<1x128xf32> to vector<36x128xf32>
    %48 = arith.addf %45, %47 : vector<36x128xf32>
    %49 = arith.addf %48, %18 : vector<36x128xf32>
    %cst_20 = arith.constant 0.000000e+00 : f32
    %50 = vector.broadcast %cst_20 : f32 to vector<36x128xf32>
    %51 = arith.maximumf %49, %50 : vector<36x128xf32>
    %c0_21 = arith.constant 0 : index
    %c0_22 = arith.constant 0 : index
    %52 = vector.load %arg5[%c0_21, %c0_22] : memref<36x128xf32, #tpu.memory_space<vmem>>, vector<36x128xf32>
    tpu.vector_store %arg5[%c0_21, %c0_22], %51 {strides = array<i32>} : memref<36x128xf32, #tpu.memory_space<vmem>>, vector<36x128xf32>,
    return
  }
  func.func @transform_0(%arg0: i32) -> (i32, i32) {
    %c0_i32 = arith.constant 0 : i32
    %c0_i32_0 = arith.constant 0 : i32
    %c0_i32_1 = arith.constant 0 : i32
    return %c0_i32, %c0_i32_0 : i32, i32
  }
  func.func @transform_1(%arg0: i32) -> (i32, i32) {
    %c0_i32 = arith.constant 0 : i32
    %c0_i32_0 = arith.constant 0 : i32
    %c0_i32_1 = arith.constant 0 : i32
    return %c0_i32, %c0_i32_0 : i32, i32
  }
  func.func @transform_2(%arg0: i32) -> (i32, i32) {
    %c0_i32 = arith.constant 0 : i32
    %c0_i32_0 = arith.constant 0 : i32
    %c0_i32_1 = arith.constant 0 : i32
    return %c0_i32, %c0_i32_0 : i32, i32
  }
  func.func @transform_3(%arg0: i32) -> (i32, i32) {
    %c0_i32 = arith.constant 0 : i32
    %c0_i32_0 = arith.constant 0 : i32
    %c0_i32_1 = arith.constant 0 : i32
    return %c0_i32, %c0_i32_0 : i32, i32
  }
  func.func @transform_4(%arg0: i32) -> (i32, i32) {
    %c0_i32 = arith.constant 0 : i32
    %c0_i32_0 = arith.constant 0 : i32
    %c0_i32_1 = arith.constant 0 : i32
    return %c0_i32, %c0_i32_0 : i32, i32
  }
}

</mosaic_0001>

<bundles_post_ra>
// kernel: residual_block_pallas.1
= control target key start
LH: loop header
LB: loop body
LE: loop exit
PB: predicated region body
PF: predicated region fallthrough
CT: control target
= control target key end

     0   :  { %vm191_vm0 = vcmask 523264   ;;  %vm382_vm7 = vcmask 1040384   ;;  %vm1015_vm12 = vmmov 1   ;;  %vm398_vm15 = vcmask 1046528   ;;  %s1391_s1 = inlined_call_operand.vmem [shape: bf16[192,256], index: 1, kind: input, shape index: {}]   ;;  %s1392_s0 = inlined_call_operand.vmem [shape: bf16[36,192], index: 0, kind: input, shape index: {}]   ;;  %s1393_s3 = inlined_call_operand.vmem [shape: f32[8,128], index: 3, kind: input, shape index: {}]   ;;  %s1394_s2 = inlined_call_operand.vmem [shape: bf16[384,128], index: 2, kind: input, shape index: {}]   ;;  %s1395_s4 = inlined_call_operand.vmem [shape: f32[36,128], index: 4, kind: output, shape index: {}]  }
   0x1   :  { %v792_v0 = vld [vmem:[%s1391_s1 + $0x70] sm:$0xf]  ;;  %v967_v1 = vld [vmem:[%s1391_s1 + $0x74] sm:$0xf0]  ;;  %v784_v2 = vld [vmem:[%s1391_s1 + $0x60] sm:$0xf] }
   0x2   :  { %v793_v3 = vor.u32 %v967_v1, %v792_v0  ;;  %v965_v4 = vld [vmem:[%s1391_s1 + $0x64] sm:$0xf0]  ;;  %v824_v5 = vld [vmem:[%s1391_s1 + $0xb0] sm:$0xf]  ;;  %v975_v6 = vld [vmem:[%s1391_s1 + $0xb4] sm:$0xf0] }
   0x3   :  { %v785_v7 = vor.u32 %v965_v4, %v784_v2  ;;  %v825_v8 = vor.u32 %v975_v6, %v824_v5  ;;  %v816_v9 = vld [vmem:[%s1391_s1 + $0xa0] sm:$0xf]  ;;  %v973_v10 = vld [vmem:[%s1391_s1 + $0xa4] sm:$0xf0]  ;;  %v776_v11 = vld [vmem:[%s1391_s1 + $0x50] sm:$0xf] }
   0x4   :  { %201 = vmatpush.bf16.msra.mxu0 %v793_v3  ;;  %1000 = vmatpush.bf16.msra.mxu2 %v793_v3  ;;  %v963_v12 = vld [vmem:[%s1391_s1 + $0x54] sm:$0xf0]  ;;  %v817_v13 = vor.u32 %v973_v10, %v816_v9  ;;  %v808_v14 = vld [vmem:[%s1391_s1 + $0x90] sm:$0xf]  ;;  %v768_v17 = vld [vmem:[%s1391_s1 + $0x40] sm:$0xf] }
   0x5   :  { %228 = vmatpush.bf16.msra.mxu1 %v825_v8  ;;  %v971_v15 = vld [vmem:[%s1391_s1 + $0x94] sm:$0xf0]  ;;  %v777_v16 = vor.u32 %v963_v12, %v776_v11  ;;  %v961_v18 = vld [vmem:[%s1391_s1 + $0x44] sm:$0xf0]  ;;  %v800_v20 = vld [vmem:[%s1391_s1 + $0x80] sm:$0xf] }
   0x6   :  { %v809_v19 = vor.u32 %v971_v15, %v808_v14  ;;  %v969_v21 = vld [vmem:[%s1391_s1 + $0x84] sm:$0xf0]  ;;  %v769_v22 = vor.u32 %v961_v18, %v768_v17  ;;  %v760_v23 = vld [vmem:[%s1391_s1 + $0x30] sm:$0xf]  ;;  %v959_v24 = vld [vmem:[%s1391_s1 + $0x34] sm:$0xf0] }
   0x7   :  { %v801_v25 = vor.u32 %v969_v21, %v800_v20  ;;  %v948_v26 = vld [vmem:[%s1392_s0 + $0x4] sm:$0xf]  ;;  %v722_v27 = vld [vmem:[%s1392_s0 + $0x8] sm:$0xf0]  ;;  %v761_v28 = vor.u32 %v959_v24, %v760_v23  ;;  %v752_v29 = vld [vmem:[%s1391_s1 + $0x20] sm:$0xf] }
   0x8   :  { %202 = vmatpush.bf16.msra.mxu0 %v785_v7  ;;  %1001 = vmatpush.bf16.msra.mxu2 %v785_v7  ;;  %v957_v30 = vld [vmem:[%s1391_s1 + $0x24] sm:$0xf0]  ;;  %v1107_v31 = vor.u32 %v948_v26, %v722_v27  ;;  %v744_v33 = vld [vmem:[%s1391_s1 + $0x10] sm:$0xf]  ;;  %v955_v34 = vld [vmem:[%s1391_s1 + $0x14] sm:$0xf0] }
   0x9   :  { %229 = vmatpush.bf16.msra.mxu1 %v817_v13  ;;  %v753_v32 = vor.u32 %v957_v30, %v752_v29  ;;  %v745_v35 = vor.u32 %v955_v34, %v744_v33  ;;  %v1120_v36 = vld [vmem:[%s1392_s0 + $0x20] sm:$0x33]  ;;  %v974_v37 = vld [vmem:[%s1391_s1 + $0xb4] sm:$0xf]  ;;  %v826_v38 = vld [vmem:[%s1391_s1 + $0xb8] sm:$0xf0] }
   0xa   :  { %v736_v39 = vld [vmem:[%s1391_s1] sm:$0xf]  ;;  %v953_v40 = vld [vmem:[%s1391_s1 + $0x4] sm:$0xf0]  ;;  %v829_v41 = vor.u32 %v974_v37, %v826_v38  ;;  %v972_v42 = vld [vmem:[%s1391_s1 + $0xa4] sm:$0xf]  ;;  %v60_v46 = vunpack.c.l.b16 %v1120_v36  ;;  %v61_v15 = vunpack.c.h.b16 %v1120_v36 }
   0xb   :  { %v966_v43 = vld [vmem:[%s1391_s1 + $0x74] sm:$0xf]  ;;  %v794_v44 = vld [vmem:[%s1391_s1 + $0x78] sm:$0xf0]  ;;  %v818_v45 = vld [vmem:[%s1391_s1 + $0xa8] sm:$0xf0]  ;;  %v737_v48 = vor.u32 %v953_v40, %v736_v39 }
   0xc   :  { %203 = vmatpush.bf16.msra.mxu0 %v777_v16  ;;  %1002 = vmatpush.bf16.msra.mxu2 %v777_v16  ;;  %v821_v47 = vor.u32 %v972_v42, %v818_v45  ;;  %v720_v49 = vld [vmem:[%s1392_s0] sm:$0xf]  ;;  %v949_v50 = vld [vmem:[%s1392_s0 + $0x4] sm:$0xf0]  ;;  %v950_v51 = vld [vmem:[%s1392_s0 + $0x14] sm:$0xf]  ;;  %v797_v52 = vor.u32 %v966_v43, %v794_v44  ;;  %v1171_v59 = vpack.c.b16 %v60_v46, %v60_v46  ;;  %v326_v42 = vlaneseq }
   0xd   :  { %230 = vmatpush.bf16.msra.mxu1 %v809_v19  ;;  %274 = vmatpush.bf16.msra.mxu3 %v829_v41  ;;  %v970_v53 = vld [vmem:[%s1391_s1 + $0x94] sm:$0xf]  ;;  %v810_v54 = vld [vmem:[%s1391_s1 + $0x98] sm:$0xf0]  ;;  %v964_v56 = vld [vmem:[%s1391_s1 + $0x64] sm:$0xf]  ;;  %v721_v58 = vor.u32 %v949_v50, %v720_v49 }
   0xe   :  { %v730_v55 = vld [vmem:[%s1392_s0 + $0x18] sm:$0xf0]  ;;  %v786_v57 = vld [vmem:[%s1391_s1 + $0x68] sm:$0xf0]  ;;  %v813_v60 = vor.u32 %v970_v53, %v810_v54  ;;  %v968_v0 = vld [vmem:[%s1391_s1 + $0x84] sm:$0xf] }
   0xf   :  { %v983_v61 = vld [vmem:[%s1394_s2 + $0x38] sm:$0xff]  ;;  %v733_v62 = vor.u32 %v950_v51, %v730_v55  ;;  %v789_v63 = vor.u32 %v964_v56, %v786_v57  ;;  %v802_v1 = vld [vmem:[%s1391_s1 + $0x88] sm:$0xf0]  ;;  %v962_v2 = vld [vmem:[%s1391_s1 + $0x54] sm:$0xf]  ;;  %v327_v46 = vshrl.u32 %v326_v42, 7 }
  0x10   :  { %204 = vmatpush.bf16.msra.mxu0 %v769_v22  ;;  %1003 = vmatpush.bf16.msra.mxu2 %v769_v22  ;;  %v778_v3 = vld [vmem:[%s1391_s1 + $0x58] sm:$0xf0]  ;;  %v805_v4 = vor.u32 %v968_v0, %v802_v1  ;;  %v960_v7 = vld [vmem:[%s1391_s1 + $0x44] sm:$0xf]  ;;  %v770_v8 = vld [vmem:[%s1391_s1 + $0x48] sm:$0xf0]  ;;  %v67_v22 = vpack.c.b16 %v61_v15, %v61_v15 }
  0x11   :  { %231 = vmatpush.bf16.msra.mxu1 %v801_v25  ;;  %275 = vmatpush.bf16.msra.mxu3 %v821_v47  ;;  %v781_v5 = vor.u32 %v962_v2, %v778_v3  ;;  %v991_v6 = vld [vmem:[%s1394_s2 + $0x78] sm:$0xff]  ;;  %v773_v9 = vor.u32 %v960_v7, %v770_v8  ;;  %v990_v10 = vld [vmem:[%s1394_s2 + $0x70] sm:$0xff]  ;;  %v956_v17 = vld [vmem:[%s1391_s1 + $0x24] sm:$0xf]  ;;  %v332_v51 = vcvt.s32.f32 %v327_v46  ;;  %v331_v8 = vadd.s32 32, %v327_v46 }
  0x12   :  { %v958_v11 = vld [vmem:[%s1391_s1 + $0x34] sm:$0xf]  ;;  %v762_v12 = vld [vmem:[%s1391_s1 + $0x38] sm:$0xf0]  ;;  %v728_v13 = vld [vmem:[%s1392_s0 + $0x10] sm:$0xf] }
  0x13   :  { %v951_v14 = vld [vmem:[%s1392_s0 + $0x14] sm:$0xf0]  ;;  %v765_v16 = vor.u32 %v958_v11, %v762_v12  ;;  %v754_v18 = vld [vmem:[%s1391_s1 + $0x28] sm:$0xf0]  ;;  %v982_v20 = vld [vmem:[%s1394_s2 + $0x30] sm:$0xff] }
  0x14   :  { %205 = vmatpush.bf16.msra.mxu0 %v761_v28  ;;  %1004 = vmatpush.bf16.msra.mxu2 %v761_v28  ;;  %v729_v19 = vor.u32 %v951_v14, %v728_v13  ;;  %v989_v21 = vld [vmem:[%s1394_s2 + $0x68] sm:$0xff]  ;;  %v757_v23 = vor.u32 %v956_v17, %v754_v18  ;;  %v954_v24 = vld [vmem:[%s1391_s1 + $0x14] sm:$0xf]  ;;  %v746_v25 = vld [vmem:[%s1391_s1 + $0x18] sm:$0xf0] }
  0x15   :  { %830 = vmatmul.msk.bf16.vlgmr.msra.gmra.mxu1 %vm191_vm0, %v1107_v31  ;;  %276 = vmatpush.bf16.msra.mxu3 %v813_v60  ;;  %v749_v26 = vor.u32 %v954_v24, %v746_v25  ;;  %v952_v27 = vld [vmem:[%s1391_s1 + $0x4] sm:$0xf]  ;;  %v738_v28 = vld [vmem:[%s1391_s1 + $0x8] sm:$0xf0]  ;;  %v987_v34 = vld [vmem:[%s1394_s2 + $0x58] sm:$0xff] }
  0x16   :  { %616 = vmatpush.bf16.msrb.mxu1 %v983_v61  ;;  %v741_v29 = vor.u32 %v952_v27, %v738_v28  ;;  %v981_v30 = vld [vmem:[%s1394_s2 + $0x28] sm:$0xff]  ;;  %v980_v33 = vld [vmem:[%s1394_s2 + $0x20] sm:$0xff]  ;;  %v979_v36 = vld [vmem:[%s1394_s2 + $0x18] sm:$0xff]  ;;  %v337_v54 = vmul.f32 0.055555556, %v332_v51 }
  0x17   :  { %v986_v37 = vld [vmem:[%s1394_s2 + $0x50] sm:$0xff]  ;;  %v997_v38 = vld [vmem:[%s1394_s2 + $0xa8] sm:$0xff]  ;;  %v996_v41 = vld [vmem:[%s1394_s2 + $0xa0] sm:$0xff] }
  0x18   :  { %206 = vmatpush.bf16.msra.mxu0 %v753_v32  ;;  %1005 = vmatpush.bf16.msra.mxu2 %v753_v32  ;;  %v999_v32 = vld [vmem:[%s1394_s2 + $0xb8] sm:$0xff]  ;;  %v978_v39 = vld [vmem:[%s1394_s2 + $0x10] sm:$0xff]  ;;  %v985_v40 = vld [vmem:[%s1394_s2 + $0x48] sm:$0xff] }
  0x19   :  { %277 = vmatpush.bf16.msra.mxu3 %v805_v4  ;;  %v995_v43 = vld [vmem:[%s1394_s2 + $0x98] sm:$0xff]  ;;  %v977_v44 = vld [vmem:[%s1394_s2 + $0x8] sm:$0xff]  ;;  %v984_v45 = vld [vmem:[%s1394_s2 + $0x40] sm:$0xff]  ;;  %v330_v4 = vadd.s32 24, %v327_v46 }
  0x1a   :  { %617 = vmatpush.bf16.msrb.mxu1 %v982_v20  ;;  %v994_v49 = vld [vmem:[%s1394_s2 + $0x90] sm:$0xff]  ;;  %v976_v50 = vld [vmem:[%s1394_s2] sm:$0xff]  ;;  %v993_v53 = vld [vmem:[%s1394_s2 + $0x88] sm:$0xff] }
  0x1b   :  { %v992_v57 = vld [vmem:[%s1394_s2 + $0x80] sm:$0xff]  ;;  %v335_v12 = vcvt.s32.f32 %v330_v4  ;;  %vm932_vm9 = vmneg %vm382_vm7 }
  0x1c   :  { %207 = vmatpush.bf16.msra.mxu0 %v745_v35  ;;  %1006 = vmatpush.bf16.msra.mxu2 %v745_v35  ;;  %v998_v35 = vld [vmem:[%s1394_s2 + $0xb0] sm:$0xff]  ;;  %v1305_v61 = vld [vmem:[%s1393_s3] ss:$0 sm:$0xff]  ;;  %vm933_vm13 = vmpackc.low %vm1015_vm12, %vm932_vm9  ;;  %vm413_vm9 = vcmask 1042432  }
  0x1d   :  { %639 = vmatpush.bf16.msrb.mxu3 %v991_v6  ;;  %v1311_v6 = vld [vmem:[%s1393_s3 + $0x1] ss:$0 sm:$0xff] }
  0x1e   :  { %833 = vmatmul.msk.bf16.vlgmr.msra.gmra.mxu3 %vm191_vm0, %v1107_v31  ;;  %v988_v31 = vld [vmem:[%s1394_s2 + $0x60] sm:$0xff]  ;;  %618 = vmatpush.bf16.msrb.mxu1 %v981_v30 }
  0x20   :  { %208 = vmatpush.bf16.msra.mxu0 %v737_v48  ;;  %1007 = vmatpush.bf16.msra.mxu2 %v737_v48  ;;  %v328_v48 = vadd.s32 8, %v327_v46 }
  0x21   :  { %640 = vmatpush.bf16.msrb.mxu3 %v990_v10 }
  0x22   :  { %619 = vmatpush.bf16.msrb.mxu1 %v980_v33 }
  0x23   :  { %209 = vmatmul.bf16.vlgmr.msra.gmra.mxu0 %v721_v58  ;;  %219 = vmatmul.bf16.vlgmr.msra.gmra.mxu2 %v1171_v59 }
  0x24   :  { %247 = vmatpush.bf16.msrb.mxu2 %v797_v52  ;;  %662 = vmatpush.bf16.msrb.mxu0 %v999_v32  ;;  %v333_v52 = vcvt.s32.f32 %v328_v48 }
  0x25   :  { %831 = vmatmul.msk.bf16.gmra.mxu1 %vm191_vm0, %v733_v62  ;;  %641 = vmatpush.bf16.msrb.mxu3 %v989_v21 }
  0x26   :  { %620 = vmatpush.bf16.msrb.mxu1 %v979_v36  ;;  %v338_v56 = vmul.f32 0.055555556, %v333_v52 }
  0x28   :  { %248 = vmatpush.bf16.msrb.mxu2 %v789_v63  ;;  %663 = vmatpush.bf16.msrb.mxu0 %v998_v35  ;;  %v343_v60 = vfloor.f32 %v338_v56 }
  0x29   :  { %642 = vmatpush.bf16.msrb.mxu3 %v988_v31 }
  0x2a   :  { %621 = vmatpush.bf16.msrb.mxu1 %v978_v39  ;;  %v348_v3 = vmul.f32 18.0, %v343_v60 }
  0x2c   :  { %249 = vmatpush.bf16.msrb.mxu2 %v781_v5  ;;  %664 = vmatpush.bf16.msrb.mxu0 %v997_v38  ;;  %v353_v10 = vsub.f32 %v333_v52, %v348_v3 }
  0x2d   :  { %643 = vmatpush.bf16.msrb.mxu3 %v987_v34 }
  0x2e   :  { %834 = vmatmul.msk.bf16.gmra.mxu3 %vm191_vm0, %v733_v62  ;;  %622 = vmatpush.bf16.msrb.mxu1 %v977_v44  ;;  %vm358_vm3 = vcmp.gt.f32.partialorder %v353_v10, 0.5  ;;  %vm363_vm4 = vcmp.lt.f32.partialorder %v353_v10, 16.5 }
  0x2f   :  { %vm1320_vm6 = vmand %vm358_vm3, %vm363_vm4 }
  0x30   :  { %250 = vmatpush.bf16.msrb.mxu2 %v773_v9  ;;  %665 = vmatpush.bf16.msrb.mxu0 %v996_v41 }
  0x31   :  { %644 = vmatpush.bf16.msrb.mxu3 %v986_v37 }
  0x32   :  { %623 = vmatpush.bf16.msrb.mxu1 %v976_v50 }
  0x33   :  { %214 = vmatmul.bf16.gmra.mxu0 %v729_v19 }
  0x34   :  { %251 = vmatpush.bf16.msrb.mxu2 %v765_v16  ;;  %666 = vmatpush.bf16.msrb.mxu0 %v995_v43  ;;  %v336_v16 = vcvt.s32.f32 %v331_v8 }
  0x35   :  { %832 = vmatmul.msk.bf16.gmra.mxu1 %vm191_vm0, %v67_v22  ;;  %645 = vmatpush.bf16.msrb.mxu3 %v985_v40 }
  0x36   :  { %v341_v24 = vmul.f32 0.055555556, %v336_v16 }
  0x38   :  { %252 = vmatpush.bf16.msrb.mxu2 %v757_v23  ;;  %667 = vmatpush.bf16.msrb.mxu0 %v994_v49  ;;  %v346_v33 = vfloor.f32 %v341_v24 }
  0x39   :  { %646 = vmatpush.bf16.msrb.mxu3 %v984_v45 }
  0x3a   :  { %v351_v44 = vmul.f32 18.0, %v346_v33 }
  0x3c   :  { %253 = vmatpush.bf16.msrb.mxu2 %v749_v26  ;;  %668 = vmatpush.bf16.msrb.mxu0 %v993_v53  ;;  %v356_v53 = vsub.f32 %v336_v16, %v351_v44 }
  0x3e   :  { %835 = vmatmul.msk.bf16.gmra.mxu3 %vm191_vm0, %v67_v22  ;;  %vm366_vm3 = vcmp.lt.f32.partialorder %v356_v53, 16.5 }
  0x40   :  { %254 = vmatpush.bf16.msrb.mxu2 %v741_v29  ;;  %669 = vmatpush.bf16.msrb.mxu0 %v992_v57 }
  0x43   :  { %255 = vmatmul.bf16.vlgmr.msrb.gmra.mxu2 %v721_v58  ;;  %v329_v58 = vadd.s32 16, %v327_v46 }
  0x45   :  { %v334_v62 = vcvt.s32.f32 %v329_v58 }
  0x47   :  { %v339_v7 = vmul.f32 0.055555556, %v334_v62 }
  0x49   :  { %v344_v14 = vfloor.f32 %v339_v7 }
  0x4b   :  { %v349_v22 = vmul.f32 18.0, %v344_v14 }
  0x4d   :  { %v354_v30 = vsub.f32 %v334_v62, %v349_v22 }
  0x4f   :  { %vm359_vm10 = vcmp.gt.f32.partialorder %v354_v30, 0.5  ;;  %vm364_vm11 = vcmp.lt.f32.partialorder %v354_v30, 16.5 }
  0x50   :  { %vm1336_vm14 = vmand %vm359_vm10, %vm364_vm11 }
  0x51   :  { %vm945_vm10 = vmpackc.low %vm413_vm9, %vm413_vm9 }
  0x53   :  { %260 = vmatmul.bf16.gmra.mxu2 %v729_v19  ;;  %v340_v19 = vmul.f32 0.055555556, %v335_v12 }
  0x55   :  { %v345_v28 = vfloor.f32 %v340_v19 }
  0x57   :  { %v350_v40 = vmul.f32 18.0, %v345_v28 }
  0x59   :  { %v355_v48 = vsub.f32 %v335_v12, %v350_v40 }
  0x5b   :  { %vm360_vm0 = vcmp.gt.f32.partialorder %v355_v48, 0.5 }
  0x63   :  { %265 = vmatmul.bf16.gmra.mxu2 %v1171_v59  ;;  %v342_v59 = vfloor.f32 %v337_v54 }
  0x65   :  { %v347_v1 = vmul.f32 18.0, %v342_v59 }
  0x67   :  { %v352_v9 = vsub.f32 %v332_v51, %v347_v1 }
  0x69   :  { %vm357_vm1 = vcmp.gt.f32.partialorder %v352_v9, 0.5  ;;  %vm362_vm2 = vcmp.lt.f32.partialorder %v352_v9, 16.5 }
  0x6a   :  { %vm1315_vm5 = vmand %vm357_vm1, %vm362_vm2  ;;  %vm365_vm1 = vcmp.lt.f32.partialorder %v355_v48, 16.5  ;;  %vm361_vm2 = vcmp.gt.f32.partialorder %v356_v53, 0.5 }
  0x6b   :  { %vm936_vm8 = vmpackc.low %vm1320_vm6, %vm1315_vm5 }
  0x6c   :  { %vm370_vm4 = vmand %vm360_vm0, %vm365_vm1 }
  0x92   :  { %v233_v47 = vpop.f32.mrf.mxu1 }
  0x9a   :  { %v235_v55 = vpop.f32.mrf.mxu1 }
  0xa0   :  { %v210_v63 = vpop.f32.mrf.mxu0 }
  0xa1   :  { %v234_v0 = vadd.f32 %v233_v47, %v210_v63  ;;  %v1012_v47 = vld [vmem:[%s1393_s3 + $0x5] ss:$0 sm:$0xff] }
  0xa2   :  { %v238_v2 = vpop.f32.mrf.mxu1 }
  0xa3   :  { %v295_v5 = vmul.f32 %v1305_v61, %v234_v0 }
  0xa5   :  { %v302_v13 = vadd.f32 %v1311_v6, %v295_v5 }
  0xa6   :  { %v220_v11 = vpop.f32.mrf.mxu2 }
  0xa7   :  { %v307_v20 = vmax.f32 %v302_v13, 0.0 }
  0xa8   :  { %v212_v15 = vpop.f32.mrf.mxu0 }
  0xa9   :  { %v236_v17 = vadd.f32 %v235_v55, %v212_v15  ;;  %v372_v31 = vsel %vm1315_vm5, %v307_v20, 0.0  ;;  %vm1348_vm5 = vmand %vm361_vm2, %vm366_vm3 }
  0xaa   :  { %v240_v18 = vpop.f32.mrf.mxu1  ;;  %v383_v37 = vrot.slane %v372_v31, 7  ;;  %v399_v57 = vrot.slane %v372_v31, 1 }
  0xab   :  { %v296_v21 = vmul.f32 %v1305_v61, %v236_v17 }
  0xad   :  { %v303_v25 = vadd.f32 %v1311_v6, %v296_v21 }
  0xae   :  { %v222_v27 = vpop.f32.mrf.mxu2 }
  0xaf   :  { %v308_v29 = vmax.f32 %v303_v25, 0.0 }
  0xb0   :  { %v215_v32 = vpop.f32.mrf.mxu0 }
  0xb1   :  { %v937_v34 = vpack.c.bf16 %v308_v29, %v307_v20  ;;  %v239_v35 = vadd.f32 %v238_v2, %v215_v32  ;;  %v373_v36 = vsel %vm1320_vm6, %v308_v29, 0.0  ;;  %vm939_vm6 = vmpackc.low %vm370_vm4, %vm1336_vm14 }
  0xb2   :  { %v384_v38 = vrot.slane %v373_v36, 7  ;;  %v243_v39 = vpop.f32.mrf.mxu1  ;;  %v400_v51 = vrot.slane %v373_v36, 1 }
  0xb3   :  { %v297_v41 = vmul.f32 %v1305_v61, %v239_v35  ;;  %938 = vmatmul.msk.bf16.vlgmr.msrb.gmra.mxu3 %vm936_vm8, %v937_v34  ;;  %v244_v42 = vadd.f32 %v243_v39, %v220_v11  ;;  %vm942_vm8 = vmpackc.low %vm1348_vm5, %vm1348_vm5 }
  0xb4   :  { %v385_v43 = vsel %vm382_vm7, %v383_v37, %v384_v38  ;;  %v401_v62 = vsel %vm398_vm15, %v399_v57, %v400_v51 }
  0xb5   :  { %v304_v45 = vadd.f32 %v1311_v6, %v297_v41  ;;  %v934_v46 = vpack.c.bf16 %v385_v43, %v383_v37  ;;  %v299_v50 = vmul.f32 %v1305_v61, %v244_v42  ;;  %v1011_v41 = vld [vmem:[%s1393_s3 + $0x4] ss:$0 sm:$0xff]  ;;  %v1013_v43 = vld [vmem:[%s1393_s3 + $0x2] ss:$0 sm:$0xff] }
  0xb7   :  { %v309_v49 = vmax.f32 %v304_v45, 0.0  ;;  %935 = vmatmul.msk.bf16.vlgmr.msrb.gmra.mxu1 %vm933_vm13, %v934_v46  ;;  %v306_v60 = vadd.f32 %v1311_v6, %v299_v50 }
  0xb8   :  { %v217_v52 = vpop.f32.mrf.mxu0 }
  0xb9   :  { %v374_v54 = vsel %vm1336_vm14, %v309_v49, 0.0  ;;  %v241_v55 = vadd.f32 %v240_v18, %v217_v52  ;;  %v311_v3 = vmax.f32 %v306_v60, 0.0 }
  0xba   :  { %v402_v56 = vrot.slane %v374_v54, 1  ;;  %v245_v58 = vpop.f32.mrf.mxu1  ;;  %v386_v5 = vrot.slane %v374_v54, 7 }
  0xbb   :  { %v298_v59 = vmul.f32 %v1305_v61, %v241_v55  ;;  %v279_v61 = vpop.f32.mrf.mxu3  ;;  %v943_v25 = vpack.c.bf16 %v311_v3, %v311_v3 }
  0xbc   :  { %v403_v63 = vsel %vm398_vm15, %v400_v51, %v402_v56  ;;  %v387_v11 = vsel %vm382_vm7, %v384_v38, %v386_v5 }
  0xbd   :  { %v305_v0 = vadd.f32 %v1311_v6, %v298_v59  ;;  %v417_v1 = vpack.c.bf16 %v403_v63, %v401_v62  ;;  %v376_v6 = vsel %vm1348_vm5, %v311_v3, 0.0 }
  0xbe   :  { %v406_v16 = vrot.slane %v376_v6, 1  ;;  %v390_v23 = vrot.slane %v376_v6, 7 }
  0xbf   :  { %v310_v2 = vmax.f32 %v305_v0, 0.0  ;;  %670 = vmatmul.bf16.vlgmr.msrb.gmra.mxu0 %v417_v1 }
  0xc0   :  { %v946_v33 = vpack.c.bf16 %v406_v16, %v406_v16 }
  0xc1   :  { %v375_v7 = vsel %vm370_vm4, %v310_v2, 0.0  ;;  %v940_v8 = vpack.c.bf16 %v310_v2, %v309_v49  ;;  %v1014_v49 = vld [vmem:[%s1393_s3 + $0x3] ss:$0 sm:$0xff] }
  0xc2   :  { %v388_v9 = vrot.slane %v375_v7, 7  ;;  %v404_v15 = vrot.slane %v375_v7, 1 }
  0xc3   :  { %941 = vmatmul.msk.bf16.gmra.mxu3 %vm939_vm6, %v940_v8  ;;  %v281_v17 = vpop.f32.mrf.mxu3 }
  0xc4   :  { %v389_v12 = vsel %vm382_vm7, %v386_v5, %v388_v9  ;;  %v405_v18 = vsel %vm398_vm15, %v402_v56, %v404_v15  ;;  %v407_v19 = vsel %vm398_vm15, %v404_v15, %v406_v16  ;;  %v391_v26 = vsel %vm382_vm7, %v388_v9, %v390_v23 }
  0xc5   :  { %v418_v13 = vpack.c.bf16 %v389_v12, %v387_v11  ;;  %v420_v22 = vpack.c.bf16 %v407_v19, %v405_v18  ;;  %v421_v29 = vpack.c.bf16 %v391_v26, %v391_v26 }
  0xc6   :  { %v256_v10 = vpop.f32.mrf.mxu2 }
  0xc7   :  { %v280_v14 = vadd.f32 %v279_v61, %v256_v10  ;;  %629 = vmatmul.bf16.gmra.mxu1 %v418_v13 }
  0xc9   :  { %v314_v46 = vmul.f32 %v1011_v41, %v280_v14 }
  0xcb   :  { %v284_v24 = vpop.f32.mrf.mxu3  ;;  %v321_v52 = vadd.f32 %v1012_v47, %v314_v46 }
  0xce   :  { %v258_v20 = vpop.f32.mrf.mxu2 }
  0xcf   :  { %v282_v21 = vadd.f32 %v281_v17, %v258_v20  ;;  %675 = vmatmul.bf16.gmra.mxu0 %v420_v22 }
  0xd1   :  { %v315_v58 = vmul.f32 %v1011_v41, %v282_v21 }
  0xd3   :  { %944 = vmatmul.msk.bf16.gmra.mxu3 %vm942_vm8, %v943_v25  ;;  %v286_v30 = vpop.f32.mrf.mxu3  ;;  %v322_v0 = vadd.f32 %v1012_v47, %v315_v58 }
  0xd6   :  { %v261_v27 = vpop.f32.mrf.mxu2 }
  0xd7   :  { %v285_v28 = vadd.f32 %v284_v24, %v261_v27  ;;  %634 = vmatmul.bf16.gmra.mxu1 %v421_v29 }
  0xd9   :  { %v316_v5 = vmul.f32 %v1011_v41, %v285_v28 }
  0xdb   :  { %v289_v34 = vpop.f32.mrf.mxu3  ;;  %v323_v10 = vadd.f32 %v1012_v47, %v316_v5 }
  0xde   :  { %v263_v31 = vpop.f32.mrf.mxu2 }
  0xdf   :  { %v287_v32 = vadd.f32 %v286_v30, %v263_v31  ;;  %947 = vmatmul.msk.bf16.gmra.mxu0 %vm945_vm10, %v946_v33 }
  0xe1   :  { %v317_v16 = vmul.f32 %v1011_v41, %v287_v32 }
  0xe3   :  { %v291_v37 = vpop.f32.mrf.mxu3  ;;  %v324_v21 = vadd.f32 %v1012_v47, %v317_v16 }
  0xe6   :  { %v266_v35 = vpop.f32.mrf.mxu2 }
  0xe7   :  { %v290_v36 = vadd.f32 %v289_v34, %v266_v35 }
  0xe9   :  { %v318_v27 = vmul.f32 %v1011_v41, %v290_v36 }
  0xeb   :  { %v325_v32 = vadd.f32 %v1012_v47, %v318_v27 }
  0xee   :  { %v268_v38 = vpop.f32.mrf.mxu2 }
 0x134   :  { %v625_v39 = vpop.f32.mrf.mxu1 }
 0x136   :  { %v648_v40 = vpop.f32.mrf.mxu3 }
 0x137   :  { %v649_v42 = vadd.f32 %v648_v40, %v625_v39 }
 0x13c   :  { %v627_v44 = vpop.f32.mrf.mxu1  ;;  %v671_v45 = vpop.f32.mrf.mxu0 }
 0x13d   :  { %v672_v48 = vadd.f32 %v671_v45, %v649_v42 }
 0x13e   :  { %v650_v50 = vpop.f32.mrf.mxu3 }
 0x13f   :  { %v687_v51 = vmul.f32 %v1013_v43, %v672_v48  ;;  %v651_v55 = vadd.f32 %v650_v50, %v627_v44 }
 0x141   :  { %v694_v53 = vadd.f32 %v1014_v49, %v687_v51 }
 0x143   :  { %v699_v54 = vadd.f32 %v694_v53, %v321_v52 }
 0x144   :  { %v630_v56 = vpop.f32.mrf.mxu1  ;;  %v673_v57 = vpop.f32.mrf.mxu0 }
 0x145   :  { %v704_v59 = vmax.f32 %v699_v54, 0.0  ;;  %v674_v60 = vadd.f32 %v673_v57, %v651_v55 }
 0x146   :  { %v653_v62 = vpop.f32.mrf.mxu3 }
 0x147   :  { %709 = vst [vmem:[%s1395_s4] sm:$0xff] %v704_v59  ;;  %v688_v63 = vmul.f32 %v1013_v43, %v674_v60  ;;  %v654_v3 = vadd.f32 %v653_v62, %v630_v56 }
 0x149   :  { %v695_v1 = vadd.f32 %v1014_v49, %v688_v63 }
 0x14b   :  { %v700_v2 = vadd.f32 %v695_v1, %v322_v0 }
 0x14c   :  { %v632_v4 = vpop.f32.mrf.mxu1  ;;  %v676_v61 = vpop.f32.mrf.mxu0 }
 0x14d   :  { %v705_v7 = vmax.f32 %v700_v2, 0.0  ;;  %v677_v8 = vadd.f32 %v676_v61, %v654_v3 }
 0x14e   :  { %v655_v9 = vpop.f32.mrf.mxu3 }
 0x14f   :  { %710 = vst [vmem:[%s1395_s4 + $0x8] sm:$0xff] %v705_v7  ;;  %v689_v6 = vmul.f32 %v1013_v43, %v677_v8  ;;  %v656_v13 = vadd.f32 %v655_v9, %v632_v4 }
 0x151   :  { %v696_v11 = vadd.f32 %v1014_v49, %v689_v6 }
 0x153   :  { %v701_v12 = vadd.f32 %v696_v11, %v323_v10 }
 0x154   :  { %v635_v14 = vpop.f32.mrf.mxu1  ;;  %v678_v15 = vpop.f32.mrf.mxu0 }
 0x155   :  { %v706_v17 = vmax.f32 %v701_v12, 0.0  ;;  %v679_v18 = vadd.f32 %v678_v15, %v656_v13 }
 0x156   :  { %v658_v19 = vpop.f32.mrf.mxu3 }
 0x157   :  { %711 = vst [vmem:[%s1395_s4 + $0x10] sm:$0xff] %v706_v17  ;;  %v690_v20 = vmul.f32 %v1013_v43, %v679_v18  ;;  %v659_v24 = vadd.f32 %v658_v19, %v635_v14 }
 0x159   :  { %v697_v22 = vadd.f32 %v1014_v49, %v690_v20 }
 0x15b   :  { %v702_v23 = vadd.f32 %v697_v22, %v324_v21 }
 0x15c   :  { %v637_v25 = vpop.f32.mrf.mxu1  ;;  %v681_v26 = vpop.f32.mrf.mxu0 }
 0x15d   :  { %v707_v28 = vmax.f32 %v702_v23, 0.0  ;;  %v682_v29 = vadd.f32 %v681_v26, %v659_v24 }
 0x15e   :  { %v660_v30 = vpop.f32.mrf.mxu3 }
 0x15f   :  { %712 = vst [vmem:[%s1395_s4 + $0x18] sm:$0xff] %v707_v28  ;;  %v691_v31 = vmul.f32 %v1013_v43, %v682_v29 }
 0x161   :  { %v698_v33 = vadd.f32 %v1014_v49, %v691_v31 }
 0x163   :  { %v703_v34 = vadd.f32 %v698_v33, %v325_v32 }
 0x164   :  { %v683_v35 = vpop.f32.mrf.mxu0 }
 0x165   :  { %v708_v37 = vmax.f32 %v703_v34, 0.0 }
 0x167   :  { %713 = vst [vmem:[%s1395_s4 + $0x20] sm:$0xf] %v708_v37 }

</bundles_post_ra>
